<compile_context>
chip_gen: v6e
topology: v6e:2x2x1
jax: 0.10.0
libtpu: 0.0.40
codegen_flags: <defaults>
</compile_context>

<pallas_src>
import jax
import jax.numpy as jnp
from jax import lax
from jax.experimental import pallas as pl
from jax.experimental.pallas import tpu as pltpu


def _vmem_limit_bytes():
    """~75% of physical VMEM (48 MiB on v7x, 96 MiB on v5e/v6e)."""
    try:
        cap = int(pltpu.get_tpu_info().vmem_capacity_bytes)
    except Exception:
        cap = 64 * 1024 * 1024          # conservative v7x-safe fallback
    return max(32 * 1024 * 1024, min(cap * 3 // 4, 100 * 1024 * 1024))


_VMEM_LIMIT = _vmem_limit_bytes()


def _pick_tile(dim, target, align):
    """Largest multiple-of-`align` divisor of `dim` that is <= `target`.
    Falls back to the full dimension (always layout-legal; never a sliver)."""
    if dim <= target:
        return dim
    t = (target // align) * align
    while t >= align:
        if dim % t == 0:
            return t
        t -= align
    return dim


# ----------------------------------------------------------------------------
# Tiled linear:  out = x @ W^T + b   (bf16 MXU operands, f32 accumulation)
# W stays in PyTorch (Cout, Cin) layout; no transposed copy is materialized.
# ----------------------------------------------------------------------------
def _linear_kernel(x_ref, w_ref, b_ref, o_ref, acc_ref):
    k = pl.program_id(2)

    @pl.when(k == 0)
    def _():
        acc_ref[...] = jnp.zeros_like(acc_ref)

    # x (tm, tk) . w (tn, tk), contracting dim 1 of both -> (tm, tn)
    acc_ref[...] += lax.dot_general(
        x_ref[...].astype(jnp.bfloat16),
        w_ref[...],
        (((1,), (1,)), ((), ())),
        preferred_element_type=jnp.float32,
    )

    @pl.when(k == pl.num_programs(2) - 1)
    def _():
        o_ref[...] = (acc_ref[...] + b_ref[...]).astype(o_ref.dtype)


def pallas_linear(x2d, w_bf16, bias_f32, *, out_dtype,
                  tile_m=512, tile_n=512, tile_k=1024):
    """x2d: (M, Cin); w_bf16: (Cout, Cin) bf16 (PyTorch layout); bias: (Cout,)."""
    M, Cin = x2d.shape
    Cout = w_bf16.shape[0]
    b2d = bias_f32.reshape(1, Cout).astype(jnp.float32)

    align_m = 16 if M % 16 == 0 else 8      # bf16 sublane packing
    tm = _pick_tile(M, tile_m, align_m)
    tn = _pick_tile(Cout, tile_n, 128)
    tk = _pick_tile(Cin, tile_k, 128)
    grid = (M // tm, Cout // tn, Cin // tk)

    cost = pl.CostEstimate(
        flops=2 * M * Cin * Cout,
        transcendentals=0,
        bytes_accessed=int(x2d.dtype.itemsize * M * Cin + 2 * Cin * Cout
                           + jnp.dtype(out_dtype).itemsize * M * Cout
                           + 4 * Cout),
    )
    return pl.pallas_call(
        _linear_kernel,
        out_shape=jax.ShapeDtypeStruct((M, Cout), out_dtype),
        grid=grid,
        in_specs=[
            pl.BlockSpec((tm, tk), lambda i, j, k: (i, k)),
            pl.BlockSpec((tn, tk), lambda i, j, k: (j, k)),   # untransposed W
            pl.BlockSpec((1, tn), lambda i, j, k: (0, j)),
        ],
        out_specs=pl.BlockSpec((tm, tn), lambda i, j, k: (i, j)),
        scratch_shapes=[pltpu.VMEM((tm, tn), jnp.float32)],
        compiler_params=pltpu.CompilerParams(
            dimension_semantics=("parallel", "parallel", "arbitrary"),
            vmem_limit_bytes=_VMEM_LIMIT,
        ),
        cost_estimate=cost,
    )(x2d, w_bf16, b2d)


# ----------------------------------------------------------------------------
# Flash-style attention over separate head-contiguous Q/K/V tensors (B, T, C)
# ----------------------------------------------------------------------------
def _make_attn_kernel(n_heads, d_k):
    def _attn_kernel(q_ref, k_ref, v_ref, o_ref, m_sc, l_sc, acc_sc, qh_sc):
        kv = pl.program_id(2)

        @pl.when(kv == 0)
        def _():
            m_sc[...] = jnp.full_like(m_sc, -jnp.inf)
            l_sc[...] = jnp.zeros_like(l_sc)
            acc_sc[...] = jnp.zeros_like(acc_sc)
            # Hoist per-head Q slicing (lane-misaligned offsets) out of the
            # kv loop: done once per (batch, q-tile).  The softmax scale is
            # already folded into the Q projection weights.
            for h in range(n_heads):
                qh_sc[h] = q_ref[0, :, h * d_k:(h + 1) * d_k]

        k_all = k_ref[0]                      # (tk, C) bf16, head-contiguous
        v_all = v_ref[0]
        for h in range(n_heads):              # static unroll over heads
            q = qh_sc[h]                                   # (tq, d_k) bf16
            k = k_all[:, h * d_k:(h + 1) * d_k]            # (tk, d_k) bf16
            v = v_all[:, h * d_k:(h + 1) * d_k]            # (tk, d_k) bf16

            # q @ k^T without materializing a transposed K tile
            s = lax.dot_general(q, k, (((1,), (1,)), ((), ())),
                                preferred_element_type=jnp.float32)  # (tq, tk)

            m_prev = m_sc[h]                                         # (tq, 1)
            m_new = jnp.maximum(m_prev, jnp.max(s, axis=-1, keepdims=True))
            alpha = jnp.exp(m_prev - m_new)                          # f32 VPU
            p = jnp.exp(s - m_new)                                   # f32 EUP
            # TODO(synk): optional v6e micro-opt - compute the row-sum as
            # P @ ones on the (underfed) MXU instead of the XLU reduce.
            l_sc[h] = alpha * l_sc[h] + jnp.sum(p, axis=-1, keepdims=True)
            acc_sc[h] = alpha * acc_sc[h] + lax.dot_general(
                p.astype(jnp.bfloat16), v, (((1,), (0,)), ((), ())),
                preferred_element_type=jnp.float32)
            m_sc[h] = m_new

        @pl.when(kv == pl.num_programs(2) - 1)
        def _():
            # Exact division (off the critical path), direct per-head stores:
            # no concatenate / relayout of the (tq, C) output tile.
            for h in range(n_heads):
                o_ref[0, :, h * d_k:(h + 1) * d_k] = (
                    acc_sc[h] / l_sc[h]).astype(o_ref.dtype)

    return _attn_kernel


def pallas_attention(q, k, v, n_heads, *, q_tile=256, kv_tile=512):
    """q, k, v: (B, T, C) bf16, head-contiguous along C (scale pre-folded in q).
    Returns (B, T, C) bf16 equal to PyTorch's out.transpose(1,2).view(B,T,C)."""
    B, T, C = q.shape
    d_k = C // n_heads

    tq = _pick_tile(T, q_tile, 256)     # MXU M dim; 256-aligned or full T
    tk = _pick_tile(T, kv_tile, 256)    # MXU N / contraction dim
    grid = (B, T // tq, T // tk)

    cost = pl.CostEstimate(
        flops=4 * B * n_heads * T * T * d_k,
        transcendentals=B * n_heads * T * T,
        bytes_accessed=int(2 * (B * T * C                       # Q read once
                                + 2 * (T // tq) * B * T * C     # K,V per q-tile
                                + B * T * C)),                  # output
    )
    return pl.pallas_call(
        _make_attn_kernel(n_heads, d_k),
        out_shape=jax.ShapeDtypeStruct((B, T, C), jnp.bfloat16),
        grid=grid,
        in_specs=[
            pl.BlockSpec((1, tq, C), lambda b, i, j: (b, i, 0)),   # Q (resident over kv)
            pl.BlockSpec((1, tk, C), lambda b, i, j: (b, j, 0)),   # K tile
            pl.BlockSpec((1, tk, C), lambda b, i, j: (b, j, 0)),   # V tile
        ],
        out_specs=pl.BlockSpec((1, tq, C), lambda b, i, j: (b, i, 0)),
        scratch_shapes=[
            pltpu.VMEM((n_heads, tq, 1), jnp.float32),      # running max  m
            pltpu.VMEM((n_heads, tq, 1), jnp.float32),      # running sum  l
            pltpu.VMEM((n_heads, tq, d_k), jnp.float32),    # f32 accumulator
            pltpu.VMEM((n_heads, tq, d_k), jnp.bfloat16),   # hoisted per-head Q
        ],
        compiler_params=pltpu.CompilerParams(
            dimension_semantics=("parallel", "parallel", "arbitrary"),
            vmem_limit_bytes=_VMEM_LIMIT,
        ),
        cost_estimate=cost,
    )(q, k, v)


# ----------------------------------------------------------------------------
# Parameter prep + full forward pass
# ----------------------------------------------------------------------------
def _split_qkv_params(w_qkv, b_qkv, n_heads, d_k):
    """Split PyTorch's fused qkv projection (per-head interleaved [q|k|v]
    along the output dim) into head-contiguous Q / K / V projections."""
    C = n_heads * d_k
    w = w_qkv.reshape(n_heads, 3, d_k, C)
    b = b_qkv.reshape(n_heads, 3, d_k)
    wq, wk, wv = (w[:, i].reshape(C, C) for i in range(3))
    bq, bk, bv = (b[:, i].reshape(C) for i in range(3))
    return (wq, bq), (wk, bk), (wv, bv)


def self_attention_forward(x, params, n_heads):
    """x: (B, T, C) float32. Reproduces the PyTorch SelfAttention.forward."""
    B, T, C = x.shape
    d_k = C // n_heads
    scale = 1.0 / float(d_k) ** 0.5

    (wq, bq), (wk, bk), (wv, bv) = _split_qkv_params(
        params["w_qkv"], params["b_qkv"], n_heads, d_k)

    # Fold 1/sqrt(d_k) into the Q projection (zero in-kernel cost) and cast the
    # weights to bf16 once outside the kernels (halves weight DMA).
    wq = (wq * scale).astype(jnp.bfloat16)
    bq = bq * scale
    wk = wk.astype(jnp.bfloat16)
    wv = wv.astype(jnp.bfloat16)
    w_out = params["w_out"].astype(jnp.bfloat16)

    x2d = x.reshape(B * T, C)
    q = pallas_linear(x2d, wq, bq, out_dtype=jnp.bfloat16)
    k = pallas_linear(x2d, wk, bk, out_dtype=jnp.bfloat16)
    v = pallas_linear(x2d, wv, bv, out_dtype=jnp.bfloat16)

    attn = pallas_attention(q.reshape(B, T, C), k.reshape(B, T, C),
                            v.reshape(B, T, C), n_heads)         # (B, T, C) bf16

    out = pallas_linear(attn.reshape(B * T, C), w_out, params["b_out"],
                        out_dtype=jnp.float32)
    return out.reshape(B, T, C)


# ----------------------------------------------------------------------------
# Pure-JAX f32 reference (mirrors the PyTorch CPU branch)
# ----------------------------------------------------------------------------
def reference_forward(x, params, n_heads):
    B, T, C = x.shape
    d_k = C // n_heads
    qkv = x.reshape(B * T, C) @ params["w_qkv"].T + params["b_qkv"]
    qkv = qkv.reshape(B, T, n_heads, 3 * d_k)
    Q, K, V = jnp.split(qkv, 3, axis=-1)
    Q = jnp.transpose(Q, (0, 2, 1, 3))
    K = jnp.transpose(K, (0, 2, 1, 3))
    V = jnp.transpose(V, (0, 2, 1, 3))
    s = jnp.einsum("bhqd,bhkd->bhqk", Q, K) / d_k ** 0.5
    p = jax.nn.softmax(s, axis=-1)
    o = jnp.einsum("bhqk,bhkd->bhqd", p, V)
    o = jnp.transpose(o, (0, 2, 1, 3)).reshape(B * T, C)
    o = o @ params["w_out"].T + params["b_out"]
    return o.reshape(B, T, C)


# ----------------------------------------------------------------------------
if __name__ == "__main__":
    n_heads = 2
    d_model = 32
    B, T = 2, 8

    key = jax.random.PRNGKey(0)
    k_x, k_wq, k_bq, k_wo, k_bo = jax.random.split(key, 5)

    # Deterministic synthetic parameters (PyTorch nn.Linear layout: (out, in)).
    bound = 1.0 / d_model ** 0.5
    params = {
        "w_qkv": jax.random.uniform(
            k_wq, (3 * d_model, d_model), jnp.float32, -bound, bound),
        "b_qkv": jax.random.uniform(
            k_bq, (3 * d_model,), jnp.float32, -bound, bound),
        "w_out": jax.random.uniform(
            k_wo, (d_model, d_model), jnp.float32, -bound, bound),
        "b_out": jax.random.uniform(
            k_bo, (d_model,), jnp.float32, -bound, bound),
    }

    x = jax.random.normal(k_x, (B, T, d_model), jnp.float32)

    out = self_attention_forward(x, params, n_heads)
    out = jax.block_until_ready(out)

    ref = reference_forward(x, params, n_heads)
    assert out.shape == (B, T, d_model)
    # bf16 MXU operands + bf16 intermediates -> relaxed tolerance vs f32 ref
    assert jnp.allclose(out, ref, atol=2e-2, rtol=2e-2), (
        float(jnp.max(jnp.abs(out - ref))))

    print("KERNEL_OK")
</pallas_src>

<mosaic_0001>
module attributes {stable_mosaic.version = 11 : i64} {
  func.func @_linear_kernel(%arg0: i32, %arg1: i32, %arg2: i32, %arg3: memref<16x32xf32, #tpu.memory_space<vmem>>, %arg4: memref<32x32xbf16, #tpu.memory_space<vmem>>, %arg5: memref<1x32xf32, #tpu.memory_space<vmem>>, %arg6: memref<16x32xbf16, #tpu.memory_space<vmem>>, %arg7: memref<16x32xf32, #tpu.memory_space<vmem>>) attributes {dimension_semantics = [#tpu.dimension_semantics<parallel>, #tpu.dimension_semantics<parallel>, #tpu.dimension_semantics<arbitrary>], iteration_bounds = array<i64: 1, 1, 1>, scalar_prefetch = 0 : i64, scratch_operands = 1 : i64, tpu.core_type = #tpu.core_type<tc>, window_params = [{transform_indices = @transform_0, window_bounds = array<i64: 16, 32>}, {transform_indices = @transform_1, window_bounds = array<i64: 32, 32>}, {transform_indices = @transform_2, window_bounds = array<i64: 1, 32>}, {transform_indices = @transform_3, window_bounds = array<i64: 16, 32>}]} {
    %c0_i32 = arith.constant 0 : i32
    %0 = arith.cmpi eq, %arg2, %c0_i32 : i32
    %1 = arith.extui %0 : i1 to i32
    %c0_i32_0 = arith.constant 0 : i32
    %2 = arith.cmpi ne, %1, %c0_i32_0 : i32
    scf.if %2 {
      %cst_10 = arith.constant 0.000000e+00 : f32
      %13 = vector.broadcast %cst_10 : f32 to vector<16x32xf32>
      %c0_11 = arith.constant 0 : index
      %c0_12 = arith.constant 0 : index
      %14 = vector.load %arg7[%c0_11, %c0_12] : memref<16x32xf32, #tpu.memory_space<vmem>>, vector<16x32xf32>
      tpu.vector_store %arg7[%c0_11, %c0_12], %13 {strides = array<i32>} : memref<16x32xf32, #tpu.memory_space<vmem>>, vector<16x32xf32>,
    } else {
    }
    %c0 = arith.constant 0 : index
    %c0_1 = arith.constant 0 : index
    %3 = vector.load %arg7[%c0, %c0_1] : memref<16x32xf32, #tpu.memory_space<vmem>>, vector<16x32xf32>
    %c0_2 = arith.constant 0 : index
    %c0_3 = arith.constant 0 : index
    %4 = vector.load %arg3[%c0_2, %c0_3] : memref<16x32xf32, #tpu.memory_space<vmem>>, vector<16x32xf32>
    %5 = arith.truncf %4 : vector<16x32xf32> to vector<16x32xbf16>
    %c0_4 = arith.constant 0 : index
    %c0_5 = arith.constant 0 : index
    %6 = vector.load %arg4[%c0_4, %c0_5] : memref<32x32xbf16, #tpu.memory_space<vmem>>, vector<32x32xbf16>
    %cst = arith.constant dense<0.000000e+00> : vector<16x32xf32>
    %7 = tpu.matmul %5, %6, %cst {dimension_numbers = #tpu.dot_dimension_numbers<[1], [1], [0], [0], [0, 0, 1, 0], [], []>} : vector<16x32xbf16>, vector<32x32xbf16>, vector<16x32xf32> -> vector<16x32xf32>
    %8 = arith.addf %3, %7 : vector<16x32xf32>
    %c0_6 = arith.constant 0 : index
    %c0_7 = arith.constant 0 : index
    %9 = vector.load %arg7[%c0_6, %c0_7] : memref<16x32xf32, #tpu.memory_space<vmem>>, vector<16x32xf32>
    tpu.vector_store %arg7[%c0_6, %c0_7], %8 {strides = array<i32>} : memref<16x32xf32, #tpu.memory_space<vmem>>, vector<16x32xf32>,
    %c0_i32_8 = arith.constant 0 : i32
    %10 = arith.cmpi eq, %arg2, %c0_i32_8 : i32
    %11 = arith.extui %10 : i1 to i32
    %c0_i32_9 = arith.constant 0 : i32
    %12 = arith.cmpi ne, %11, %c0_i32_9 : i32
    scf.if %12 {
      %c0_10 = arith.constant 0 : index
      %c0_11 = arith.constant 0 : index
      %13 = vector.load %arg7[%c0_10, %c0_11] : memref<16x32xf32, #tpu.memory_space<vmem>>, vector<16x32xf32>
      %c0_12 = arith.constant 0 : index
      %c0_13 = arith.constant 0 : index
      %14 = vector.load %arg5[%c0_12, %c0_13] : memref<1x32xf32, #tpu.memory_space<vmem>>, vector<1x32xf32>
      %15 = vector.broadcast %14 : vector<1x32xf32> to vector<16x32xf32>
      %16 = arith.addf %13, %15 : vector<16x32xf32>
      %17 = arith.truncf %16 : vector<16x32xf32> to vector<16x32xbf16>
      %c0_14 = arith.constant 0 : index
      %c0_15 = arith.constant 0 : index
      %18 = vector.load %arg6[%c0_14, %c0_15] : memref<16x32xbf16, #tpu.memory_space<vmem>>, vector<16x32xbf16>
      tpu.vector_store %arg6[%c0_14, %c0_15], %17 {strides = array<i32>} : memref<16x32xbf16, #tpu.memory_space<vmem>>, vector<16x32xbf16>,
    } else {
    }
    return
  }
  func.func @transform_0(%arg0: i32, %arg1: i32, %arg2: i32) -> (i32, i32) {
    %c0_i32 = arith.constant 0 : i32
    return %arg0, %arg2 : i32, i32
  }
  func.func @transform_1(%arg0: i32, %arg1: i32, %arg2: i32) -> (i32, i32) {
    %c0_i32 = arith.constant 0 : i32
    return %arg1, %arg2 : i32, i32
  }
  func.func @transform_2(%arg0: i32, %arg1: i32, %arg2: i32) -> (i32, i32) {
    %c0_i32 = arith.constant 0 : i32
    %c0_i32_0 = arith.constant 0 : i32
    return %c0_i32, %arg1 : i32, i32
  }
  func.func @transform_3(%arg0: i32, %arg1: i32, %arg2: i32) -> (i32, i32) {
    %c0_i32 = arith.constant 0 : i32
    return %arg0, %arg1 : i32, i32
  }
}

</mosaic_0001>

<bundles_post_ra>
// kernel: tpu_custom_call.1
= control target key start
LH: loop header
LB: loop body
LE: loop exit
PB: predicated region body
PF: predicated region fallthrough
CT: control target
= control target key end

     0   :  { %8 = vsyncpa [#allocation4], 0  ;;  %s318_s0 = inlined_call_operand.hbm [shape: f32[16,32], index: 0, kind: input, shape index: {}]   ;;  %s319_s1 = inlined_call_operand.hbm [shape: bf16[32,32], index: 1, kind: input, shape index: {}]   ;;  %s320_s2 = inlined_call_operand.vmem [shape: f32[1,32], index: 2, kind: input, shape index: {}]   ;;  %s321_s3 = inlined_call_operand.hbm [shape: bf16[16,32], index: 3, kind: output, shape index: {}]  }
   0x1   :  { %9 = vsyncpa [#allocation7], 0 }
   0x2   :  { %10 = vsyncpa [#allocation5], 0  ;;  %s264_s12 = smov [#allocation3]  }
   0x3   :  { %s16_s13 = sshll.u32 %s264_s12, 4  ;;  %s17_s13 = int_to_ptr.vmem [resolvable:$true] %s16_s13 }
   0x4   :  { %s206_s14 = scalar_lea.vmem %s17_s13, 256  ;;  %p211_p1 = scmp.lt.s32.totalorder %s17_s13, %s17_s13 }
   0x5   :  { %p207_p0 = scmp.ne.s32.totalorder %s17_s13, %s206_s14  ;;  %p212_p2 = scmp.lt.s32.totalorder %s206_s14, %s206_s14 }
   0x7   :  { %p213_p3 = por %p212_p2, %p211_p1 }
   0x9   :  { %p214_p4 = pnand %p213_p3, %p207_p0 }
   0xb   :  { %217 = shalt.err (!%p214_p4)
}
   0xc   :  { %s265_s15 = smov 128   ;;  %s266_s16 = smov 8  }
   0xd   :  { %22 = dma.hbm_to_vmem [thread:$0]  %s318_s0, 256, %s17_s13, [#allocation4], %s265_s15, %s265_s15, %s266_s16  }
   0xe   :  { %s267_s19 = smov [#allocation6]  }
   0xf   :  { %s28_s20 = sshll.u32 %s267_s19, 4  ;;  %s29_s20 = int_to_ptr.vmem [resolvable:$true] %s28_s20 }
  0x10   :  { %s226_s21 = scalar_lea.vmem %s29_s20, 256  ;;  %p231_p6 = scmp.lt.s32.totalorder %s29_s20, %s29_s20 }
  0x11   :  { %p227_p5 = scmp.ne.s32.totalorder %s29_s20, %s226_s21  ;;  %p232_p7 = scmp.lt.s32.totalorder %s226_s21, %s226_s21 }
  0x13   :  { %p233_p8 = por %p232_p7, %p231_p6 }
  0x15   :  { %p234_p9 = pnand %p233_p8, %p227_p5 }
  0x17   :  { %237 = shalt.err (!%p234_p9)
}
  0x18   :  { %s268_s22 = smov 64   ;;  %s269_s23 = smov 4  }
  0x19   :  { %34 = dma.hbm_to_vmem [thread:$0]  %s319_s1, 256, %s29_s20, [#allocation7], %s268_s22, %s268_s22, %s269_s23  }
  0x1a   :  { %258 = dma.done.wait [#allocation4], 256  }
  0x1b   :  { %259 = vsyncadd [#allocation4], 4294967040 }
  0x1c   :  { %260 = dma.done.wait [#allocation7], 256  }
  0x1d   :  { %261 = vsyncadd [#allocation7], 4294967040  ;;  %vm48_vm0 = vcmask 261120   ;;  %v270_v0 = vmov 0.0   ;;  %vm271_vm1 = vmmov 0   ;;  %v196_v1 = vld [vmem:[#allocation6 + $0x8] sm:$0xff]  }
  0x1e   :  { %49 = vst.msk [vmem:[#allocation2] sm:$0xff] %vm48_vm0, %v270_v0  ;;  %50 = vst.msk [vmem:[#allocation2 + $0x8] sm:$0xff] %vm48_vm0, %v270_v0  ;;  %179 = vmatprep.subr.bf16.mxu0 %v270_v0  ;;  %183 = vmatprep.mubr.msk.bf16.mxu0 %vm271_vm1, %v270_v0  ;;  %v78_v2 = vsel %vm48_vm0, %v196_v1, 0  ;;  %v197_v3 = vld [vmem:[#allocation6] sm:$0xff]   ;;  %v53_v5 = vld [vmem:[#allocation3] sm:$0xff]  ;;  %vm147_vm2 = vcmask 257024  }
  0x1f   :  { %180 = vmatpush3.bf16.xpose.msra.mxu0 %v78_v2  ;;  %v75_v4 = vsel %vm48_vm0, %v197_v3, 0  ;;  %v54_v6 = vld [vmem:[#allocation3 + $0x8] sm:$0xff]  ;;  %v171_v16 = vld [vmem:[%s320_s2] ss:$0 sm:$0xff]  ;;  %s272_s26 = smov [#allocation8]  }
  0x20   :  { %181 = vmatprep.subr.bf16.mxu0 %v270_v0  ;;  %v55_v7 = vpack.c.bf16 %v54_v6, %v53_v5  ;;  %s155_s27 = sshll.u32 %s272_s26, 4  ;;  %s156_s27 = int_to_ptr.vmem [resolvable:$true] %s155_s27 }
  0x21   :  { %s238_s28 = scalar_lea.vmem %s156_s27, 128  ;;  %p243_p11 = scmp.lt.s32.totalorder %s156_s27, %s156_s27 }
  0x22   :  { %p239_p10 = scmp.ne.s32.totalorder %s156_s27, %s238_s28  ;;  %p244_p12 = scmp.lt.s32.totalorder %s238_s28, %s238_s28 }
  0x24   :  { %p245_p13 = por %p244_p12, %p243_p11 }
  0x25   :  { %v51_v8 = vld [vmem:[#allocation2] sm:$0xff]  ;;  %v52_v12 = vld [vmem:[#allocation2 + $0x8] sm:$0xff] }
  0x26   :  { %p246_p0 = pnand %p245_p13, %p239_p10 }
  0x27   :  { %182 = vmatpush3.bf16.xpose.msra.mxu0 %v75_v4 }
  0x2e   :  { %184 = vmatmul.mubr.msk.bf16.vlgmr.msra.gmra.mxu0 %vm48_vm0, %v55_v7 }
  0xee   :  { %v114_v9 = vpop.f32.mrf.mxu0 }
  0xef   :  { %v121_v10 = vadd.f32 %v114_v9, %v51_v8 }
  0xf0   :  { %v185_v11 = vpop.f32.mrf.mxu0 }
  0xf1   :  { %123 = vst.msk [vmem:[#allocation2] sm:$0xff] %vm48_vm0, %v121_v10 }
  0xf2   :  { %v117_v13 = vpop.f32.mrf.mxu0 }
  0xf3   :  { %v122_v14 = vadd.f32 %v117_v13, %v52_v12 }
  0xf4   :  { %v186_v15 = vpop.f32.mrf.mxu0 }
  0xf5   :  { %124 = vst.msk [vmem:[#allocation2 + $0x8] sm:$0xff] %vm48_vm0, %v122_v14 }
  0xf8   :  { %v128_v17 = vld [vmem:[#allocation2] sm:$0xff] }
  0xf9   :  { %v137_v18 = vadd.f32 %v171_v16, %v128_v17 }
  0xfb   :  { %v174_v19 = vpack.c.bf16 %v137_v18, %v137_v18 }
  0xfc   :  { %v129_v20 = vld [vmem:[#allocation2 + $0x8] sm:$0xff] }
  0xfd   :  { %v138_v21 = vadd.f32 %v171_v16, %v129_v20  ;;  %148 = vst.msk [vmem:[#allocation8] sm:$0xf] %vm147_vm2, %v174_v19 }
  0xff   :  { %v175_v22 = vpack.c.bf16 %v138_v21, %v138_v21 }
 0x101   :  { %149 = vst.msk [vmem:[#allocation8 + $0x4] sm:$0xf] %vm147_vm2, %v175_v22 }
 0x102   :  { %249 = shalt.err (!%p246_p0)
}
 0x103   :  { %161 = dma.vmem_to_hbm [thread:$0]  %s156_s27, 128, %s321_s3, [#allocation5], %s268_s22, %s268_s22, %s269_s23  }
 0x104   :  { %262 = dma.done.wait [#allocation5], 128  }
 0x105   :  { %263 = vsyncadd [#allocation5], 4294967168 }
 0x106   :  { %165 = vsyncpa [#allocation4], 1 }
 0x107   :  { %166 = vsyncpa [#allocation7], 1 }
 0x108   :  { %167 = vsyncpa [#allocation5], 1 }

</bundles_post_ra>
